<compile_context>
chip_gen: v7x
topology: tpu7x:2x2x1
jax: 0.10.0
libtpu: 0.0.40
codegen_flags: <defaults>
</compile_context>

<pallas_src>
import functools

import numpy as np
import jax
import jax.numpy as jnp
from jax.experimental import pallas as pl
from jax.experimental.pallas import tpu as pltpu


def _ephn_kernel(fq_ref, fk_ref, lq_ref, lk_ref, out_ref,
                 m_pos, m_neg, d0, *, sigma, n_real):
    """Grid step (qi, ki): query rows [qi*T, (qi+1)*T) vs key rows [ki*Tn, (ki+1)*Tn).

    Per-step shapes:
      fq_ref : (T,  D) bf16  pre-normalized query embeddings (tiled over qi)
      fk_ref : (Tn, D) bf16  pre-normalized key embeddings   (tiled over ki)
      lq_ref : (1,  T) i32   query labels
      lk_ref : (Tn, 1) i32   key labels
      out_ref: (8,  T) f32   packed per-row outputs (written on the last key step):
                             rows = [Pos, Neg, V_pos, V_neg, Prob, mask, 0, 0]
      m_pos, m_neg, d0 : (1, T) f32 VMEM carries across the key ("arbitrary") axis.
    """
    qi = pl.program_id(0)
    ki = pl.program_id(1)

    @pl.when(ki == 0)
    def _():
        m_pos[...] = jnp.full_like(m_pos, -1.0)
        m_neg[...] = jnp.full_like(m_neg, -1.0)

    fq = fq_ref[...]
    fk = fk_ref[...]
    lq = lq_ref[...]
    lk = lk_ref[...]
    tile_m = lq.shape[1]
    tile_n = fk.shape[0]

    # Gram block, transposed orientation (keys on sublanes, queries on lanes):
    # bf16 MXU inputs, f32 accumulation.
    dist = jax.lax.dot_general(
        fk, fq, (((1,), (1,)), ((), ())),
        preferred_element_type=jnp.float32)                       # (Tn, T) f32

    k_idx = jax.lax.broadcasted_iota(jnp.int32, (tile_n, 1), 0) + ki * tile_n
    q_idx = jax.lax.broadcasted_iota(jnp.int32, (1, tile_m), 1) + qi * tile_m

    diag = k_idx == q_idx
    dist = jnp.where(diag, -1.0, dist)        # distMC(..., sq=True): diag = -norm = -1

    @pl.when(ki == 0)
    def _():
        d0[...] = dist[0:1, :]                # Dist[row, 0]: torch's tie-break fallback

    pad_key = k_idx >= n_real                 # zero-padded key rows are never candidates
    same_lbl = lk == lq

    # Easy-positive candidates: same label, non-duplicate (> 0.9999 excluded), real key.
    # (The diagonal already holds -1, so its exclusion is implicit.)
    # TODO(synk): with bf16 MXU inputs, exact-duplicate embeddings can land slightly
    # below torch's 0.9999 exclusion threshold; run the matmul in f32 if duplicates
    # are expected.
    d_p = jnp.where(jnp.logical_not(same_lbl) | pad_key | (dist > 0.9999), -1.0, dist)
    # Hard-negative candidates (self.semi == False path): different label, real key.
    d_n = jnp.where(same_lbl | pad_key, -1.0, dist)

    m_pos[...] = jnp.maximum(m_pos[...], jnp.max(d_p, axis=0, keepdims=True))
    m_neg[...] = jnp.maximum(m_neg[...], jnp.max(d_n, axis=0, keepdims=True))

    @pl.when(ki == pl.num_programs(1) - 1)
    def _():
        v_pos = m_pos[...]
        v_neg = m_neg[...]
        # Torch gathers Dist[row, argmax]: when the max is unmasked that IS the max,
        # and when every candidate is masked (max == -1) the first argmax is column 0.
        pos = jnp.where(v_pos > -1.0, v_pos, d0[...])
        neg = jnp.where(v_neg > -1.0, v_neg, d0[...])

        # Prob = -log_softmax([Pos, Neg] / sigma, dim=1)[:, 0]  (stable 2-term LSE).
        inv_sigma = 1.0 / sigma
        ps = pos * inv_sigma
        ns = neg * inv_sigma
        m = jnp.maximum(ps, ns)
        prob = (m + jnp.log(jnp.exp(ps - m) + jnp.exp(ns - m))) - ps
        maskf = ((v_pos > 0.0) & (v_neg > 0.0)).astype(jnp.float32)  # Mask_not_drop

        # One packed lane-dense (8, T) store (rows 6-7 are padding).
        r = jax.lax.broadcasted_iota(jnp.int32, (8, tile_m), 0)
        out_ref[...] = jnp.where(
            r == 0, pos,
            jnp.where(r == 1, neg,
            jnp.where(r == 2, v_pos,
            jnp.where(r == 3, v_neg,
            jnp.where(r == 4, prob,
            jnp.where(r == 5, maskf, 0.0))))))


def _round_up(x, m):
    return ((x + m - 1) // m) * m


def _vmem_capacity_bytes():
    try:
        cap = int(getattr(pltpu.get_tpu_info(), "vmem_capacity_bytes", 0))
        if cap > 0:
            return cap
    except Exception:
        pass
    return 64 * 1024 * 1024          # v7x-sized (most conservative) fallback


def _query_tile_pref():
    # v6e/v7x MXUs are 256-wide; v5e is native at 128 (and has only 1 vst slot).
    try:
        if "v5" in jax.devices()[0].device_kind.lower():
            return 128
    except Exception:
        pass
    return 256


def _plan_tiling(N):
    """Return (tile_m, tile_n, n_pad).  Per-step VMEM is bounded independent of N."""
    if N <= 1024:
        # tile_m=128 keeps >= 2 "parallel" query steps even for tiny N (v7x megacore).
        tile_m, tile_n = 128, 256
        n_pad = max(_round_up(N, 256), 256)
    else:
        tile_m, tile_n = _query_tile_pref(), 512
        n_pad = _round_up(N, 512)
    return tile_m, tile_n, n_pad


@functools.partial(jax.jit, static_argnames=("sigma",))
def ephn_loss_pallas(fvec, labels, sigma=0.1):
    N, D = fvec.shape
    fvec = fvec.astype(jnp.float32)
    lbl = labels.astype(jnp.int32)

    tile_m, tile_n, n_pad = _plan_tiling(N)
    vmem_cap = _vmem_capacity_bytes()
    vmem_limit = max(int(min(vmem_cap, 128 << 20) * 0.75), 32 << 20)

    # Hoisted F.normalize(p=2, dim=1): done ONCE, in f32, then cast to bf16 so the
    # kernel streams half-width tiles and never re-normalizes / re-casts the key side.
    ssq = jnp.sum(fvec * fvec, axis=1, keepdims=True)
    fnorm = (fvec * jax.lax.rsqrt(jnp.maximum(ssq, 1e-24))).astype(jnp.bfloat16)

    fpad = jnp.pad(fnorm, ((0, n_pad - N), (0, 0)))
    lpad = jnp.pad(lbl, (0, n_pad - N), constant_values=-1)

    cost = pl.CostEstimate(
        flops=2 * n_pad * n_pad * D,
        transcendentals=3 * n_pad,
        bytes_accessed=2 * n_pad * D * 2 + 2 * n_pad * 4 + 8 * n_pad * 4)

    packed = pl.pallas_call(
        functools.partial(_ephn_kernel, sigma=float(sigma), n_real=N),
        out_shape=jax.ShapeDtypeStruct((8, n_pad), jnp.float32),
        grid=(n_pad // tile_m, n_pad // tile_n),
        in_specs=[
            pl.BlockSpec((tile_m, D), lambda qi, ki: (qi, 0)),   # query rows (per qi)
            pl.BlockSpec((tile_n, D), lambda qi, ki: (ki, 0)),   # key rows (per ki)
            pl.BlockSpec((1, tile_m), lambda qi, ki: (0, qi)),   # query labels
            pl.BlockSpec((tile_n, 1), lambda qi, ki: (ki, 0)),   # key labels
        ],
        out_specs=pl.BlockSpec((8, tile_m), lambda qi, ki: (0, qi)),
        scratch_shapes=[pltpu.VMEM((1, tile_m), jnp.float32)] * 3,
        compiler_params=pltpu.CompilerParams(
            dimension_semantics=("parallel", "arbitrary"),
            vmem_limit_bytes=vmem_limit),
        cost_estimate=cost,
    )(fpad, fpad, lpad.reshape(1, n_pad), lpad.reshape(n_pad, 1))

    packed = packed[:, :N]
    pos, neg = packed[0], packed[1]
    v_pos, v_neg = packed[2], packed[3]
    prob, maskf = packed[4], packed[5]

    # Tiny scalar reductions over per-row outputs, outside the kernel.
    cnt = jnp.sum(maskf)
    loss = jnp.sum(prob * maskf) / cnt     # NaN if no row survives (torch mean-of-empty)
    gap = jnp.mean(pos) - jnp.mean(neg)    # Pos_log.mean() - Neg_log.mean()
    rt = jnp.mean(maskf)                   # Mask_not_drop.float().mean() (torch prints)
    return loss, pos, neg, v_pos, v_neg, gap, rt


if __name__ == "__main__":
    key = jax.random.PRNGKey(0)
    N, D, C = 16, 32, 4                    # 16 samples, 32-dim embeddings, 4 classes
    kc, kn = jax.random.split(key)
    labels = jnp.asarray(np.repeat(np.arange(C), N // C), dtype=jnp.int32)
    centroids = jax.random.normal(kc, (C, D), dtype=jnp.float32)
    fvec = centroids[labels] + 0.3 * jax.random.normal(kn, (N, D), dtype=jnp.float32)

    loss, pos, neg, v_pos, v_neg, gap, rt = ephn_loss_pallas(fvec, labels, sigma=0.1)
    jax.block_until_ready(loss)

    # Host-side glue reproducing the ragged torch return values.
    # TODO(synk): boolean-mask indexing (Pos_log[V_pos > 0]) yields data-dependent
    # shapes with no static-shape Pallas equivalent; assembled on host from outputs.
    pos_np, neg_np = np.asarray(pos), np.asarray(neg)
    vpos_np, vneg_np = np.asarray(v_pos), np.asarray(v_neg)
    pos_log = np.concatenate([pos_np[vpos_np > 0], np.array([0.0, 1.0], np.float32)])
    neg_log = np.concatenate([neg_np[vneg_np > 0], np.array([0.0, 1.0], np.float32)])
    result = (float(loss), pos_log, neg_log, float(gap))

    if np.isfinite(result[0]) and np.isfinite(result[3]):
        print("KERNEL_OK")
</pallas_src>

<mosaic_0001>
module attributes {stable_mosaic.version = 11 : i64} {
  func.func @_ephn_kernel(%arg0: i32, %arg1: i32, %arg2: memref<128x32xbf16, #tpu.memory_space<vmem>>, %arg3: memref<256x32xbf16, #tpu.memory_space<vmem>>, %arg4: memref<1x128xi32, #tpu.memory_space<vmem>>, %arg5: memref<256x1xi32, #tpu.memory_space<vmem>>, %arg6: memref<8x128xf32, #tpu.memory_space<vmem>>, %arg7: memref<1x128xf32, #tpu.memory_space<vmem>>, %arg8: memref<1x128xf32, #tpu.memory_space<vmem>>, %arg9: memref<1x128xf32, #tpu.memory_space<vmem>>) attributes {dimension_semantics = [#tpu.dimension_semantics<parallel>, #tpu.dimension_semantics<arbitrary>], iteration_bounds = array<i64: 2, 1>, scalar_prefetch = 0 : i64, scratch_operands = 3 : i64, tpu.core_type = #tpu.core_type<tc>, window_params = [{transform_indices = @transform_0, window_bounds = array<i64: 128, 32>}, {transform_indices = @transform_1, window_bounds = array<i64: 256, 32>}, {transform_indices = @transform_2, window_bounds = array<i64: 1, 128>}, {transform_indices = @transform_3, window_bounds = array<i64: 256, 1>}, {transform_indices = @transform_4, window_bounds = array<i64: 8, 128>}]} {
    %c0_i32 = arith.constant 0 : i32
    %0 = arith.cmpi eq, %arg1, %c0_i32 : i32
    %1 = arith.extui %0 : i1 to i32
    %c0_i32_0 = arith.constant 0 : i32
    %2 = arith.cmpi ne, %1, %c0_i32_0 : i32
    scf.if %2 {
      %cst_27 = arith.constant -1.000000e+00 : f32
      %54 = vector.broadcast %cst_27 : f32 to vector<1x128xf32>
      %c0_28 = arith.constant 0 : index
      %c0_29 = arith.constant 0 : index
      %55 = vector.load %arg7[%c0_28, %c0_29] : memref<1x128xf32, #tpu.memory_space<vmem>>, vector<1x128xf32>
      tpu.vector_store %arg7[%c0_28, %c0_29], %54 {strides = array<i32>} : memref<1x128xf32, #tpu.memory_space<vmem>>, vector<1x128xf32>,
      %cst_30 = arith.constant -1.000000e+00 : f32
      %56 = vector.broadcast %cst_30 : f32 to vector<1x128xf32>
      %c0_31 = arith.constant 0 : index
      %c0_32 = arith.constant 0 : index
      %57 = vector.load %arg8[%c0_31, %c0_32] : memref<1x128xf32, #tpu.memory_space<vmem>>, vector<1x128xf32>
      tpu.vector_store %arg8[%c0_31, %c0_32], %56 {strides = array<i32>} : memref<1x128xf32, #tpu.memory_space<vmem>>, vector<1x128xf32>,
    } else {
    }
    %c0 = arith.constant 0 : index
    %c0_1 = arith.constant 0 : index
    %3 = vector.load %arg2[%c0, %c0_1] : memref<128x32xbf16, #tpu.memory_space<vmem>>, vector<128x32xbf16>
    %c0_2 = arith.constant 0 : index
    %c0_3 = arith.constant 0 : index
    %4 = vector.load %arg3[%c0_2, %c0_3] : memref<256x32xbf16, #tpu.memory_space<vmem>>, vector<256x32xbf16>
    %c0_4 = arith.constant 0 : index
    %c0_5 = arith.constant 0 : index
    %5 = vector.load %arg4[%c0_4, %c0_5] : memref<1x128xi32, #tpu.memory_space<vmem>>, vector<1x128xi32>
    %c0_6 = arith.constant 0 : index
    %c0_7 = arith.constant 0 : index
    %6 = vector.load %arg5[%c0_6, %c0_7] : memref<256x1xi32, #tpu.memory_space<vmem>>, vector<256x1xi32>
    %cst = arith.constant dense<0.000000e+00> : vector<256x128xf32>
    %7 = tpu.matmul %4, %3, %cst {dimension_numbers = #tpu.dot_dimension_numbers<[1], [1], [0], [0], [0, 0, 1, 0], [], []>} : vector<256x32xbf16>, vector<128x32xbf16>, vector<256x128xf32> -> vector<256x128xf32>
    %8 = tpu.iota {dimensions = array<i32: 0>} : vector<256x1xi32>
    %c256_i32 = arith.constant 256 : i32
    %9 = arith.muli %arg1, %c256_i32 : i32
    %10 = vector.broadcast %9 : i32 to vector<256x1xi32>
    %11 = arith.addi %8, %10 : vector<256x1xi32>
    %12 = tpu.iota {dimensions = array<i32: 1>} : vector<1x128xi32>
    %c128_i32 = arith.constant 128 : i32
    %13 = arith.muli %arg0, %c128_i32 : i32
    %14 = vector.broadcast %13 : i32 to vector<1x128xi32>
    %15 = arith.addi %12, %14 : vector<1x128xi32>
    %16 = vector.broadcast %11 : vector<256x1xi32> to vector<256x128xi32>
    %17 = vector.broadcast %15 : vector<1x128xi32> to vector<256x128xi32>
    %18 = arith.cmpi eq, %16, %17 : vector<256x128xi32>
    %cst_8 = arith.constant -1.000000e+00 : f32
    %19 = vector.broadcast %cst_8 : f32 to vector<256x128xf32>
    %20 = arith.select %18, %19, %7 : vector<256x128xi1>, vector<256x128xf32>
    %c0_i32_9 = arith.constant 0 : i32
    %21 = arith.cmpi eq, %arg1, %c0_i32_9 : i32
    %22 = arith.extui %21 : i1 to i32
    %c0_i32_10 = arith.constant 0 : i32
    %23 = arith.cmpi ne, %22, %c0_i32_10 : i32
    scf.if %23 {
      %54 = vector.extract_strided_slice %20 {offsets = [0, 0], sizes = [1, 128], strides = [1, 1]} : vector<256x128xf32> to vector<1x128xf32>
      %c0_27 = arith.constant 0 : index
      %c0_28 = arith.constant 0 : index
      %55 = vector.load %arg9[%c0_27, %c0_28] : memref<1x128xf32, #tpu.memory_space<vmem>>, vector<1x128xf32>
      tpu.vector_store %arg9[%c0_27, %c0_28], %54 {strides = array<i32>} : memref<1x128xf32, #tpu.memory_space<vmem>>, vector<1x128xf32>,
    } else {
    }
    %c16_i32 = arith.constant 16 : i32
    %24 = vector.broadcast %c16_i32 : i32 to vector<256x1xi32>
    %25 = arith.cmpi sge, %11, %24 : vector<256x1xi32>
    %26 = vector.broadcast %6 : vector<256x1xi32> to vector<256x128xi32>
    %27 = vector.broadcast %5 : vector<1x128xi32> to vector<256x128xi32>
    %28 = arith.cmpi eq, %26, %27 : vector<256x128xi32>
    %cst_11 = arith.constant dense<true> : vector<256x128xi1>
    %29 = arith.xori %28, %cst_11 : vector<256x128xi1>
    %30 = vector.broadcast %25 : vector<256x1xi1> to vector<256x128xi1>
    %31 = arith.ori %29, %30 : vector<256x128xi1>
    %cst_12 = arith.constant 0.999899983 : f32
    %32 = vector.broadcast %cst_12 : f32 to vector<256x128xf32>
    %33 = arith.cmpf ogt, %20, %32 : vector<256x128xf32>
    %34 = arith.ori %31, %33 : vector<256x128xi1>
    %cst_13 = arith.constant -1.000000e+00 : f32
    %35 = vector.broadcast %cst_13 : f32 to vector<256x128xf32>
    %36 = arith.select %34, %35, %20 : vector<256x128xi1>, vector<256x128xf32>
    %37 = vector.broadcast %25 : vector<256x1xi1> to vector<256x128xi1>
    %38 = arith.ori %28, %37 : vector<256x128xi1>
    %cst_14 = arith.constant -1.000000e+00 : f32
    %39 = vector.broadcast %cst_14 : f32 to vector<256x128xf32>
    %40 = arith.select %38, %39, %20 : vector<256x128xi1>, vector<256x128xf32>
    %c0_15 = arith.constant 0 : index
    %c0_16 = arith.constant 0 : index
    %41 = vector.load %arg7[%c0_15, %c0_16] : memref<1x128xf32, #tpu.memory_space<vmem>>, vector<1x128xf32>
    %cst_17 = arith.constant dense<0xFF800000> : vector<128xf32>
    %42 = vector.multi_reduction <maximumf>, %36, %cst_17 [0] : vector<256x128xf32> to vector<128xf32>
    %43 = vector.shape_cast %42 : vector<128xf32> to vector<1x128xf32>
    %44 = arith.maximumf %41, %43 : vector<1x128xf32>
    %c0_18 = arith.constant 0 : index
    %c0_19 = arith.constant 0 : index
    %45 = vector.load %arg7[%c0_18, %c0_19] : memref<1x128xf32, #tpu.memory_space<vmem>>, vector<1x128xf32>
    tpu.vector_store %arg7[%c0_18, %c0_19], %44 {strides = array<i32>} : memref<1x128xf32, #tpu.memory_space<vmem>>, vector<1x128xf32>,
    %c0_20 = arith.constant 0 : index
    %c0_21 = arith.constant 0 : index
    %46 = vector.load %arg8[%c0_20, %c0_21] : memref<1x128xf32, #tpu.memory_space<vmem>>, vector<1x128xf32>
    %cst_22 = arith.constant dense<0xFF800000> : vector<128xf32>
    %47 = vector.multi_reduction <maximumf>, %40, %cst_22 [0] : vector<256x128xf32> to vector<128xf32>
    %48 = vector.shape_cast %47 : vector<128xf32> to vector<1x128xf32>
    %49 = arith.maximumf %46, %48 : vector<1x128xf32>
    %c0_23 = arith.constant 0 : index
    %c0_24 = arith.constant 0 : index
    %50 = vector.load %arg8[%c0_23, %c0_24] : memref<1x128xf32, #tpu.memory_space<vmem>>, vector<1x128xf32>
    tpu.vector_store %arg8[%c0_23, %c0_24], %49 {strides = array<i32>} : memref<1x128xf32, #tpu.memory_space<vmem>>, vector<1x128xf32>,
    %c0_i32_25 = arith.constant 0 : i32
    %51 = arith.cmpi eq, %arg1, %c0_i32_25 : i32
    %52 = arith.extui %51 : i1 to i32
    %c0_i32_26 = arith.constant 0 : i32
    %53 = arith.cmpi ne, %52, %c0_i32_26 : i32
    scf.if %53 {
      %c0_27 = arith.constant 0 : index
      %c0_28 = arith.constant 0 : index
      %54 = vector.load %arg7[%c0_27, %c0_28] : memref<1x128xf32, #tpu.memory_space<vmem>>, vector<1x128xf32>
      %c0_29 = arith.constant 0 : index
      %c0_30 = arith.constant 0 : index
      %55 = vector.load %arg8[%c0_29, %c0_30] : memref<1x128xf32, #tpu.memory_space<vmem>>, vector<1x128xf32>
      %cst_31 = arith.constant -1.000000e+00 : f32
      %56 = vector.broadcast %cst_31 : f32 to vector<1x128xf32>
      %57 = arith.cmpf ogt, %54, %56 : vector<1x128xf32>
      %c0_32 = arith.constant 0 : index
      %c0_33 = arith.constant 0 : index
      %58 = vector.load %arg9[%c0_32, %c0_33] : memref<1x128xf32, #tpu.memory_space<vmem>>, vector<1x128xf32>
      %59 = arith.select %57, %54, %58 : vector<1x128xi1>, vector<1x128xf32>
      %cst_34 = arith.constant -1.000000e+00 : f32
      %60 = vector.broadcast %cst_34 : f32 to vector<1x128xf32>
      %61 = arith.cmpf ogt, %55, %60 : vector<1x128xf32>
      %c0_35 = arith.constant 0 : index
      %c0_36 = arith.constant 0 : index
      %62 = vector.load %arg9[%c0_35, %c0_36] : memref<1x128xf32, #tpu.memory_space<vmem>>, vector<1x128xf32>
      %63 = arith.select %61, %55, %62 : vector<1x128xi1>, vector<1x128xf32>
      %cst_37 = arith.constant 1.000000e+01 : f32
      %64 = vector.broadcast %cst_37 : f32 to vector<1x128xf32>
      %65 = arith.mulf %59, %64 : vector<1x128xf32>
      %cst_38 = arith.constant 1.000000e+01 : f32
      %66 = vector.broadcast %cst_38 : f32 to vector<1x128xf32>
      %67 = arith.mulf %63, %66 : vector<1x128xf32>
      %68 = arith.maximumf %65, %67 : vector<1x128xf32>
      %69 = arith.subf %65, %68 : vector<1x128xf32>
      %70 = math.exp %69 : vector<1x128xf32>
      %71 = arith.subf %67, %68 : vector<1x128xf32>
      %72 = math.exp %71 : vector<1x128xf32>
      %73 = arith.addf %70, %72 : vector<1x128xf32>
      %74 = math.log %73 : vector<1x128xf32>
      %75 = arith.addf %68, %74 : vector<1x128xf32>
      %76 = arith.subf %75, %65 : vector<1x128xf32>
      %cst_39 = arith.constant 0.000000e+00 : f32
      %77 = vector.broadcast %cst_39 : f32 to vector<1x128xf32>
      %78 = arith.cmpf ogt, %54, %77 : vector<1x128xf32>
      %cst_40 = arith.constant 0.000000e+00 : f32
      %79 = vector.broadcast %cst_40 : f32 to vector<1x128xf32>
      %80 = arith.cmpf ogt, %55, %79 : vector<1x128xf32>
      %81 = arith.andi %78, %80 : vector<1x128xi1>
      %82 = arith.extui %81 : vector<1x128xi1> to vector<1x128xi32>
      %83 = arith.sitofp %82 : vector<1x128xi32> to vector<1x128xf32>
      %84 = tpu.iota {dimensions = array<i32: 0>} : vector<8x128xi32>
      %c0_i32_41 = arith.constant 0 : i32
      %85 = vector.broadcast %c0_i32_41 : i32 to vector<8x128xi32>
      %86 = arith.cmpi eq, %84, %85 : vector<8x128xi32>
      %c1_i32 = arith.constant 1 : i32
      %87 = vector.broadcast %c1_i32 : i32 to vector<8x128xi32>
      %88 = arith.cmpi eq, %84, %87 : vector<8x128xi32>
      %c2_i32 = arith.constant 2 : i32
      %89 = vector.broadcast %c2_i32 : i32 to vector<8x128xi32>
      %90 = arith.cmpi eq, %84, %89 : vector<8x128xi32>
      %c3_i32 = arith.constant 3 : i32
      %91 = vector.broadcast %c3_i32 : i32 to vector<8x128xi32>
      %92 = arith.cmpi eq, %84, %91 : vector<8x128xi32>
      %c4_i32 = arith.constant 4 : i32
      %93 = vector.broadcast %c4_i32 : i32 to vector<8x128xi32>
      %94 = arith.cmpi eq, %84, %93 : vector<8x128xi32>
      %c5_i32 = arith.constant 5 : i32
      %95 = vector.broadcast %c5_i32 : i32 to vector<8x128xi32>
      %96 = arith.cmpi eq, %84, %95 : vector<8x128xi32>
      %cst_42 = arith.constant 0.000000e+00 : f32
      %97 = vector.shape_cast %83 : vector<1x128xf32> to vector<1x128xf32>
      %98 = vector.broadcast %97 : vector<1x128xf32> to vector<8x128xf32>
      %99 = vector.broadcast %cst_42 : f32 to vector<8x128xf32>
      %100 = arith.select %96, %98, %99 : vector<8x128xi1>, vector<8x128xf32>
      %101 = vector.shape_cast %76 : vector<1x128xf32> to vector<1x128xf32>
      %102 = vector.broadcast %101 : vector<1x128xf32> to vector<8x128xf32>
      %103 = arith.select %94, %102, %100 : vector<8x128xi1>, vector<8x128xf32>
      %104 = vector.shape_cast %55 : vector<1x128xf32> to vector<1x128xf32>
      %105 = vector.broadcast %104 : vector<1x128xf32> to vector<8x128xf32>
      %106 = arith.select %92, %105, %103 : vector<8x128xi1>, vector<8x128xf32>
      %107 = vector.shape_cast %54 : vector<1x128xf32> to vector<1x128xf32>
      %108 = vector.broadcast %107 : vector<1x128xf32> to vector<8x128xf32>
      %109 = arith.select %90, %108, %106 : vector<8x128xi1>, vector<8x128xf32>
      %110 = vector.shape_cast %63 : vector<1x128xf32> to vector<1x128xf32>
      %111 = vector.broadcast %110 : vector<1x128xf32> to vector<8x128xf32>
      %112 = arith.select %88, %111, %109 : vector<8x128xi1>, vector<8x128xf32>
      %113 = vector.shape_cast %59 : vector<1x128xf32> to vector<1x128xf32>
      %114 = vector.broadcast %113 : vector<1x128xf32> to vector<8x128xf32>
      %115 = arith.select %86, %114, %112 : vector<8x128xi1>, vector<8x128xf32>
      %c0_43 = arith.constant 0 : index
      %c0_44 = arith.constant 0 : index
      %116 = vector.load %arg6[%c0_43, %c0_44] : memref<8x128xf32, #tpu.memory_space<vmem>>, vector<8x128xf32>
      tpu.vector_store %arg6[%c0_43, %c0_44], %115 {strides = array<i32>} : memref<8x128xf32, #tpu.memory_space<vmem>>, vector<8x128xf32>,
    } else {
    }
    return
  }
  func.func @transform_0(%arg0: i32, %arg1: i32) -> (i32, i32) {
    %c0_i32 = arith.constant 0 : i32
    %c0_i32_0 = arith.constant 0 : i32
    return %arg0, %c0_i32 : i32, i32
  }
  func.func @transform_1(%arg0: i32, %arg1: i32) -> (i32, i32) {
    %c0_i32 = arith.constant 0 : i32
    %c0_i32_0 = arith.constant 0 : i32
    return %arg1, %c0_i32 : i32, i32
  }
  func.func @transform_2(%arg0: i32, %arg1: i32) -> (i32, i32) {
    %c0_i32 = arith.constant 0 : i32
    %c0_i32_0 = arith.constant 0 : i32
    return %c0_i32, %arg0 : i32, i32
  }
  func.func @transform_3(%arg0: i32, %arg1: i32) -> (i32, i32) {
    %c0_i32 = arith.constant 0 : i32
    %c0_i32_0 = arith.constant 0 : i32
    return %arg1, %c0_i32 : i32, i32
  }
  func.func @transform_4(%arg0: i32, %arg1: i32) -> (i32, i32) {
    %c0_i32 = arith.constant 0 : i32
    %c0_i32_0 = arith.constant 0 : i32
    return %c0_i32, %arg0 : i32, i32
  }
}

</mosaic_0001>

<bundles_post_ra>
// kernel: ephn_loss_pallas.1
= control target key start
LH: loop header
LB: loop body
LE: loop exit
PB: predicated region body
PF: predicated region fallthrough
CT: control target
= control target key end

     0   :  { %s1832_s15 = smov 0   ;;  %s1834_s16 = smov 0   ;;  %s1995_s0 = inlined_call_operand.vmem [shape: bf16[256,32], index: 0, kind: input, shape index: {}, may-alias: {0,1}]   ;;  %s1996_s1 = inlined_call_operand.vmem [shape: bf16[256,32], index: 1, kind: input, shape index: {}, may-alias: {0,1}]   ;;  %s1997_s2 = inlined_call_operand.vmem [shape: s32[1,256], index: 2, kind: input, shape index: {}]   ;;  %s1998_s3 = inlined_call_operand.vmem [shape: s32[256,1], index: 3, kind: input, shape index: {}]   ;;  %s1999_s4 = inlined_call_operand.vmem [shape: f32[8,256], index: 4, kind: output, shape index: {}]  }
   0x1   :  { %s1836_s17 = smov 0  }
   0x2 LB: > { %s26_s18 = sadd.s32 1, %s1797_s16  ;;  %p1567_p0 = scmp.ge.s32.totalorder %s1801_s17, 1  ;;  %s1801_s17 = sphi %s1836_s17, %s14_s17   ;;  %s1797_s16 = sphi %s1834_s16, %s2001_s16   ;;  %s1793_s15 = sphi %s1832_s15, %s2000_s15  }
   0x3   : > { %p28_p1 = scmp.ge.s32.totalorder %s26_s18, 2  ;;  %p205_p2 = scmp.lt.s32.totalorder %s1801_s17, 3 }
   0x5   : > { %s2003_s18 = smov (%p28_p1, %s26_s18), 0  ;;  %p206_p3 = pnand %p1567_p0, %p205_p2 }
   0x6   : > { %s1568_s19 = sshll.u32 (!%p206_p3), %s1793_s15, 4  ;;  %v1757_v0 = vld [vmem:[%s1996_s1] sm:$0xff] (!%p206_p3)   ;;  %vm476_vm0 = vcmask (!%p206_p3), 261120   ;;  %v1803_v2 = vmov (!%p206_p3), 0   ;;  %v325_v9 = vld [vmem:[%s1998_s3 + $0x8] sm:$0xff] (!%p206_p3)  ;;  %v1761_v23 = vld [vmem:[%s1996_s1 + $0x10] sm:$0xff] (!%p206_p3)   ;;  %v710_v36 = vlaneseq (!%p206_p3) }
   0x7   : > { %209 = sbr.rel (%p206_p3) target bundleno = 390 (0x186), region = 36  ;;  %p244_p4 = scmp.lt.s32.totalorder (!%p206_p3), %s1568_s19, 31  ;;  %1656 = vmatprep.mubr.msk.bf16.mxu0 (!%p206_p3), %vm476_vm0, %v1757_v0  ;;  %v1759_v1 = vld [vmem:[%s1996_s1 + $0x40] sm:$0xff] (!%p206_p3)   ;;  %1748 = vset.pattern.permute.xlu0 (!%p206_p3), %v1803_v2  ;;  %v1758_v21 = vld [vmem:[%s1996_s1 + $0x8] sm:$0xff] (!%p206_p3)   ;;  %v1762_v24 = vld [vmem:[%s1996_s1 + $0x50] sm:$0xff] (!%p206_p3)   ;;  %v1804_v35 = vmov (!%p206_p3), -1.0  }
   0x8   : > { %1672 = vmatprep.mubr.msk.bf16.mxu1 (!%p206_p3), %vm476_vm0, %v1759_v1  ;;  %v324_v8 = vld [vmem:[%s1998_s3] sm:$0xff] (!%p206_p3)  ;;  %v1760_v22 = vld [vmem:[%s1996_s1 + $0x48] sm:$0xff] (!%p206_p3)   ;;  %v1763_v25 = vld [vmem:[%s1996_s1 + $0x18] sm:$0xff] (!%p206_p3)   ;;  %273 = vst [vmem:[#allocation2] sm:$0x1] (!%p206_p3), %v1804_v35  ;;  %p255_p5 = scmp.lt.s32.totalorder (!%p206_p3), %s1793_s15, 1 }
   0x9   : > { %883 = vperm.xlu0 (!%p206_p3), %1748, %v324_v8   ;;  %v1764_v26 = vld [vmem:[%s1996_s1 + $0x58] sm:$0xff] (!%p206_p3)   ;;  %v1765_v27 = vld [vmem:[%s1996_s1 + $0x20] sm:$0xff] (!%p206_p3)   ;;  %v1767_v29 = vld [vmem:[%s1996_s1 + $0x28] sm:$0xff] (!%p206_p3)   ;;  %274 = vst [vmem:[#allocation3] sm:$0x1] (!%p206_p3), %v1804_v35  ;;  %s1611_s12 = sshll.u32 (!%p206_p3), %s1793_s15, 7 }
   0xa   : > { %v1766_v28 = vld [vmem:[%s1996_s1 + $0x60] sm:$0xff] (!%p206_p3)   ;;  %v1768_v30 = vld [vmem:[%s1996_s1 + $0x68] sm:$0xff] (!%p206_p3)   ;;  %v1769_v31 = vld [vmem:[%s1996_s1 + $0x30] sm:$0xff] (!%p206_p3)   ;;  %v778_v37 = vand.u32 (!%p206_p3), 127, %v710_v36  ;;  %v780_v38 = vstv (!%p206_p3), %s1611_s12  ;;  %v1965_v40 = vshrl.u32 (!%p206_p3), %v710_v36, 7  ;;  %vm1805_vm5 = vmmov (!%p206_p3), 1  }
   0xb   : > { %v1770_v32 = vld [vmem:[%s1996_s1 + $0x70] sm:$0xff] (!%p206_p3)   ;;  %v1771_v33 = vld [vmem:[%s1996_s1 + $0x38] sm:$0xff] (!%p206_p3)  }
   0xc   : > { %v1772_v34 = vld [vmem:[%s1996_s1 + $0x78] sm:$0xff] (!%p206_p3)   ;;  %v781_v41 = vadd.s32 (!%p206_p3), %v780_v38, %v778_v37  ;;  %v712_v43 = vadd.s32 (!%p206_p3), 8, %v1965_v40 }
   0xd   : > { %886 = vperm.xlu0 (!%p206_p3), %1748, %v325_v9  }
   0xe   : > { %s2005_s19 = smov (!%p244_p4, %s1568_s19), 31  ;;  %s2007_s15 = smov (!%p255_p5, %s1793_s15), 1  ;;  %vm782_vm1 = vcmp.eq.s32.totalorder %v1965_v40, %v781_v41  ;;  %vm783_vm3 = vcmp.eq.s32.totalorder %v712_v43, %v781_v41 }
   0xf   : > { %s1569_s24 = sshll.u32 %s2005_s19, 2  ;;  %s257_s19 = scalar_lea.vmem %s1997_s2, %s2007_s15 }
  0x10   : > { %s1864_s27 = scalar_lea.vmem %s1995_s0, %s1569_s24  ;;  %v1612_v42 = vld [vmem:[%s257_s19] ss:$0 sm:$0xff]  ;;  %s1570_s20 = sshll.u32 %s2007_s15, 3 }
  0x11   : > { %v1749_v3 = vld [vmem:[%s1864_s27] sm:$0xff]   ;;  %v1750_v4 = vld [vmem:[%s1864_s27 + $0x8] sm:$0xff]   ;;  %v1751_v7 = vld [vmem:[%s1864_s27 + $0x10] sm:$0xff]   ;;  %s267_s23 = scalar_lea.vmem %s1999_s4, %s1570_s20 }
  0x12   : > { %1704 = vmatprep.subr.msk.bf16.mxu0 %vm476_vm0, %v1749_v3  ;;  %v526_v5 = vsel %vm476_vm0, %v1749_v3, 0  ;;  %1705 = vmatprep.subr.msk.bf16.mxu1 %vm476_vm0, %v1749_v3  ;;  %v529_v6 = vsel %vm476_vm0, %v1750_v4, 0  ;;  %v532_v10 = vsel %vm476_vm0, %v1751_v7, 0  ;;  %v1752_v11 = vld [vmem:[%s1864_s27 + $0x18] sm:$0xff]   ;;  %v1753_v13 = vld [vmem:[%s1864_s27 + $0x20] sm:$0xff]   ;;  %v1754_v15 = vld [vmem:[%s1864_s27 + $0x28] sm:$0xff]  }
  0x13   : > { %1641 = vmatpush3.bf16.xpose.msra.mxu0 %v526_v5  ;;  %1696 = vmatpush3.bf16.xpose.msra.mxu1 %v526_v5  ;;  %v535_v12 = vsel %vm476_vm0, %v1752_v11, 0  ;;  %v538_v14 = vsel %vm476_vm0, %v1753_v13, 0  ;;  %v541_v16 = vsel %vm476_vm0, %v1754_v15, 0  ;;  %v1755_v17 = vld [vmem:[%s1864_s27 + $0x30] sm:$0xff]   ;;  %v1756_v19 = vld [vmem:[%s1864_s27 + $0x38] sm:$0xff]  }
  0x14   : > { %1706 = vmatprep.subr.msk.bf16.mxu0 %vm476_vm0, %v1750_v4  ;;  %1707 = vmatprep.subr.msk.bf16.mxu1 %vm476_vm0, %v1750_v4  ;;  %v544_v18 = vsel %vm476_vm0, %v1755_v17, 0  ;;  %v547_v20 = vsel %vm476_vm0, %v1756_v19, 0 }
  0x1b   : > { %1643 = vmatpush3.bf16.xpose.msra.mxu0 %v529_v6  ;;  %1697 = vmatpush3.bf16.xpose.msra.mxu1 %v529_v6 }
  0x1c   : > { %1708 = vmatprep.subr.msk.bf16.mxu0 %vm476_vm0, %v1751_v7  ;;  %1709 = vmatprep.subr.msk.bf16.mxu1 %vm476_vm0, %v1751_v7 }
  0x23   : > { %1645 = vmatpush3.bf16.xpose.msra.mxu0 %v532_v10  ;;  %1698 = vmatpush3.bf16.xpose.msra.mxu1 %v532_v10 }
  0x24   : > { %1710 = vmatprep.subr.msk.bf16.mxu0 %vm476_vm0, %v1752_v11  ;;  %1711 = vmatprep.subr.msk.bf16.mxu1 %vm476_vm0, %v1752_v11 }
  0x2b   : > { %1647 = vmatpush3.bf16.xpose.msra.mxu0 %v535_v12  ;;  %1699 = vmatpush3.bf16.xpose.msra.mxu1 %v535_v12 }
  0x2c   : > { %1712 = vmatprep.subr.msk.bf16.mxu0 %vm476_vm0, %v1753_v13  ;;  %1713 = vmatprep.subr.msk.bf16.mxu1 %vm476_vm0, %v1753_v13 }
  0x33   : > { %1649 = vmatpush3.bf16.xpose.msra.mxu0 %v538_v14  ;;  %1700 = vmatpush3.bf16.xpose.msra.mxu1 %v538_v14 }
  0x34   : > { %1714 = vmatprep.subr.msk.bf16.mxu0 %vm476_vm0, %v1754_v15  ;;  %1715 = vmatprep.subr.msk.bf16.mxu1 %vm476_vm0, %v1754_v15 }
  0x3b   : > { %1651 = vmatpush3.bf16.xpose.msra.mxu0 %v541_v16  ;;  %1701 = vmatpush3.bf16.xpose.msra.mxu1 %v541_v16 }
  0x3c   : > { %1716 = vmatprep.subr.msk.bf16.mxu0 %vm476_vm0, %v1755_v17  ;;  %1717 = vmatprep.subr.msk.bf16.mxu1 %vm476_vm0, %v1755_v17 }
  0x43   : > { %1653 = vmatpush3.bf16.xpose.msra.mxu0 %v544_v18  ;;  %1702 = vmatpush3.bf16.xpose.msra.mxu1 %v544_v18 }
  0x44   : > { %1718 = vmatprep.subr.msk.bf16.mxu0 %vm476_vm0, %v1756_v19  ;;  %1719 = vmatprep.subr.msk.bf16.mxu1 %vm476_vm0, %v1756_v19 }
  0x4b   : > { %1655 = vmatpush3.bf16.xpose.msra.mxu0 %v547_v20  ;;  %1703 = vmatpush3.bf16.xpose.msra.mxu1 %v547_v20 }
  0x52   : > { %1657 = vmatmul.mubr.msk.bf16.vlgmr.msra.gmra.mrb[0].mxu0 %vm476_vm0, %v1758_v21  ;;  %1673 = vmatmul.mubr.msk.bf16.vlgmr.msra.gmra.mrb[0].mxu1 %vm476_vm0, %v1760_v22 }
  0x53   : > { %1660 = vmatprep.mubr.msk.bf16.mxu0 %vm476_vm0, %v1761_v23  ;;  %1676 = vmatprep.mubr.msk.bf16.mxu1 %vm476_vm0, %v1762_v24 }
  0x5a   : > { %1661 = vmatmul.mubr.msk.bf16.gmra.mrb[4].mxu0 %vm476_vm0, %v1763_v25  ;;  %1677 = vmatmul.mubr.msk.bf16.gmra.mrb[4].mxu1 %vm476_vm0, %v1764_v26 }
  0x5b   : > { %1664 = vmatprep.mubr.msk.bf16.mxu0 %vm476_vm0, %v1765_v27  ;;  %1680 = vmatprep.mubr.msk.bf16.mxu1 %vm476_vm0, %v1766_v28 }
  0x62   : > { %1665 = vmatmul.mubr.msk.bf16.gmra.mrb[8].mxu0 %vm476_vm0, %v1767_v29  ;;  %1681 = vmatmul.mubr.msk.bf16.gmra.mrb[8].mxu1 %vm476_vm0, %v1768_v30 }
  0x63   : > { %1668 = vmatprep.mubr.msk.bf16.mxu0 %vm476_vm0, %v1769_v31  ;;  %1684 = vmatprep.mubr.msk.bf16.mxu1 %vm476_vm0, %v1770_v32 }
  0x6a   : > { %1669 = vmatmul.mubr.msk.bf16.gmra.mrb[12].mxu0 %vm476_vm0, %v1771_v33  ;;  %1685 = vmatmul.mubr.msk.bf16.gmra.mrb[12].mxu1 %vm476_vm0, %v1772_v34 }
  0x88   : > { %v884_v39 = vpop.permute.xlu0 %883 }
  0x89   : > { %vm982_vm2 = vcmp.eq.s32.totalorder %v884_v39, %v1612_v42 }
  0x8a   : > { %vm1014_vm6 = vmxor %vm982_vm2, %vm1805_vm5 }
  0x8c   : > { %v887_v44 = vpop.permute.xlu0 %886 }
  0x8d   : > { %vm983_vm4 = vcmp.eq.s32.totalorder %v887_v44, %v1612_v42 }
  0x8e   : > { %vm1015_vm9 = vmxor %vm983_vm4, %vm1805_vm5  ;;  %vm1412_vm5 = vcmp.eq.s32.totalorder %v1965_v40, 1 }
 0x125   : > { %v1658_v45 = vpop.f32.mrb[0].mxu0  ;;  %v1674_v46 = vpop.f32.mrb[0].mxu1 }
 0x126   : > { %v583_v47 = vpop.f32.mrb[1].mxu0  ;;  %v647_v48 = vpop.f32.mrb[1].mxu1 }
 0x127   : > { %v814_v49 = vsel %vm782_vm1, -1.0, %v583_v47  ;;  %v1659_v50 = vpop.f32.mrb[2].mxu0  ;;  %v1675_v51 = vpop.f32.mrb[2].mxu1  ;;  %vm1416_vm1 = vcmp.eq.s32.totalorder %v1965_v40, 5 }
 0x128   : > { %849 = vst [vmem:[#allocation4] sm:$0x1] %v814_v49  ;;  %vm1142_vm7 = vcmp.gt.f32.partialorder %v814_v49, 0.9999  ;;  %v1270_v52 = vsel %vm982_vm2, -1.0, %v814_v49  ;;  %v586_v53 = vpop.f32.mrb[3].mxu0 }
 0x129   : > { %v650_v54 = vpop.f32.mrb[3].mxu1  ;;  %vm1174_vm8 = vmor %vm1014_vm6, %vm1142_vm7  ;;  %v1343_v55 = vmax.f32 %v1270_v52, -1.0  ;;  %v815_v56 = vsel %vm783_vm3, -1.0, %v586_v53  ;;  %vm1415_vm2 = vcmp.eq.s32.totalorder %v1965_v40, 4  ;;  %vm1414_vm3 = vcmp.eq.s32.totalorder %v1965_v40, 3 }
 0x12a   : > { %v1206_v57 = vsel %vm1174_vm8, -1.0, %v814_v49  ;;  %vm1143_vm10 = vcmp.gt.f32.partialorder %v815_v56, 0.9999  ;;  %v1271_v58 = vsel %vm983_vm4, -1.0, %v815_v56  ;;  %vm1413_vm4 = vcmp.eq.s32.totalorder %v1965_v40, 2 }
 0x12b   : > { %v1303_v59 = vmax.f32 %v1206_v57, -1.0  ;;  %v1347_v60 = vmax.f32 %v1343_v55, -1.0  ;;  %vm1175_vm11 = vmor %vm1015_vm9, %vm1143_vm10  ;;  %v1344_v61 = vmax.f32 %v1271_v58, -1.0  ;;  %vm1411_vm6 = vcmp.eq.s32.totalorder %v1965_v40, 0 }
 0x12c   : > { %v1207_v62 = vsel %vm1175_vm11, -1.0, %v815_v56 }
 0x12d   : > { %v1307_v63 = vmax.f32 %v1303_v59, -1.0  ;;  %v1351_v0 = vmax.f32 %v1347_v60, -1.0  ;;  %v1304_v1 = vmax.f32 %v1207_v62, -1.0  ;;  %v1348_v2 = vmax.f32 %v1344_v61, -1.0  ;;  %v1662_v3 = vpop.f32.mrb[4].mxu0  ;;  %v1678_v4 = vpop.f32.mrb[4].mxu1 }
 0x12e   : > { %v599_v5 = vpop.f32.mrb[5].mxu0  ;;  %v663_v6 = vpop.f32.mrb[5].mxu1  ;;  %v1342_v61 = vld [vmem:[#allocation3] sm:$0x1] }
 0x12f   : > { %v1311_v7 = vmax.f32 %v1307_v63, -1.0  ;;  %v1355_v8 = vmax.f32 %v1351_v0, -1.0  ;;  %v1308_v9 = vmax.f32 %v1304_v1, -1.0  ;;  %v1352_v10 = vmax.f32 %v1348_v2, -1.0  ;;  %v1663_v11 = vpop.f32.mrb[6].mxu0  ;;  %v1679_v12 = vpop.f32.mrb[6].mxu1 }
 0x130   : > { %v602_v17 = vpop.f32.mrb[7].mxu0  ;;  %v666_v18 = vpop.f32.mrb[7].mxu1  ;;  %v1302_v0 = vld [vmem:[#allocation2] sm:$0x1]  ;;  %v1388_v5 = vld [vmem:[#allocation4] sm:$0x1] }
 0x131   : > { %v1315_v13 = vmax.f32 %v1311_v7, -1.0  ;;  %v1359_v14 = vmax.f32 %v1355_v8, -1.0  ;;  %v1312_v15 = vmax.f32 %v1308_v9, -1.0  ;;  %v1356_v16 = vmax.f32 %v1352_v10, -1.0 }
 0x133   : > { %v1319_v19 = vmax.f32 %v1315_v13, -1.0  ;;  %v1363_v20 = vmax.f32 %v1359_v14, -1.0  ;;  %v1316_v21 = vmax.f32 %v1312_v15, -1.0  ;;  %v1360_v22 = vmax.f32 %v1356_v16, -1.0 }
 0x135   : > { %v1323_v23 = vmax.f32 %v1319_v19, -1.0  ;;  %v1320_v24 = vmax.f32 %v1316_v21, -1.0  ;;  %v1364_v25 = vmax.f32 %v1360_v22, -1.0  ;;  %v1666_v26 = vpop.f32.mrb[8].mxu0  ;;  %v1682_v27 = vpop.f32.mrb[8].mxu1  ;;  %v1367_v30 = vmax.f32 %v1363_v20, -1.0 }
 0x136   : > { %v615_v28 = vpop.f32.mrb[9].mxu0  ;;  %v679_v29 = vpop.f32.mrb[9].mxu1  ;;  %v1806_v21 = vmov 0.0  }
 0x137   : > { %v1324_v31 = vmax.f32 %v1320_v24, -1.0  ;;  %v1368_v32 = vmax.f32 %v1364_v25, -1.0  ;;  %v1667_v33 = vpop.f32.mrb[10].mxu0  ;;  %v1683_v34 = vpop.f32.mrb[10].mxu1  ;;  %v1327_v37 = vmax.f32 %v1323_v23, -1.0  ;;  %v1420_v23 = vsub.s32 0, %v1965_v40 }
 0x138   : > { %v618_v35 = vpop.f32.mrb[11].mxu0  ;;  %v682_v36 = vpop.f32.mrb[11].mxu1 }
 0x139   : > { %v1328_v38 = vmax.f32 %v1324_v31, -1.0  ;;  %v1371_v39 = vmax.f32 %v1367_v30, %v1368_v32 }
 0x13b   : > { %v1331_v41 = vmax.f32 %v1327_v37, %v1328_v38  ;;  %v1373_v42 = vmax.f32 %v1371_v39, -1.0 }
 0x13d   : > { %v1333_v43 = vmax.f32 %v1331_v41, -1.0  ;;  %v1374_v44 = vrot.slane %v1373_v42, 4  ;;  %v1670_v45 = vpop.f32.mrb[12].mxu0  ;;  %v1686_v46 = vpop.f32.mrb[12].mxu1 }
 0x13e   : > { %v631_v47 = vpop.f32.mrb[13].mxu0  ;;  %v695_v48 = vpop.f32.mrb[13].mxu1 }
 0x13f   : > { %v1334_v49 = vrot.slane %v1333_v43, 4  ;;  %v1375_v50 = vmax.f32 %v1373_v42, %v1374_v44  ;;  %v1671_v51 = vpop.f32.mrb[14].mxu0  ;;  %v1687_v52 = vpop.f32.mrb[14].mxu1 }
 0x140   : > { %v634_v53 = vpop.f32.mrb[15].mxu0  ;;  %v698_v54 = vpop.f32.mrb[15].mxu1 }
 0x141   : > { %v1335_v55 = vmax.f32 %v1333_v43, %v1334_v49  ;;  %v1376_v56 = vrot.slane %v1375_v50, 2 }
 0x143   : > { %v1336_v57 = vrot.slane %v1335_v55, 2  ;;  %v1377_v58 = vmax.f32 %v1375_v50, %v1376_v56 }
 0x145   : > { %v1337_v59 = vmax.f32 %v1335_v55, %v1336_v57  ;;  %v1378_v60 = vrot.slane %v1377_v58, 1 }
 0x147   : > { %v1338_v62 = vrot.slane %v1337_v59, 1  ;;  %v1379_v63 = vmax.f32 %v1377_v58, %v1378_v60 }
 0x149   : > { %v1339_v1 = vmax.f32 %v1337_v59, %v1338_v62  ;;  %v1380_v2 = vmax.f32 %v1342_v61, %v1379_v63 }
 0x14b   : > { %v1340_v3 = vmax.f32 %v1302_v0, %v1339_v1  ;;  %1381 = vst [vmem:[#allocation3] sm:$0x1] %v1380_v2 }
 0x14d   : > { %1341 = vst [vmem:[#allocation2] sm:$0x1] %v1340_v3 }
 0x152   : > { %v1386_v4 = vld [vmem:[#allocation3] sm:$0x1] }
 0x153   : > { %vm1390_vm12 = vcmp.gt.f32.partialorder %v1386_v4, -1.0  ;;  %vm1407_vm15 = vcmp.gt.f32.partialorder %v1386_v4, 0.0  ;;  %v1435_v29 = vrot.slane %v1386_v4, %v1420_v23 }
 0x154   : > { %v1385_v6 = vld [vmem:[#allocation2] sm:$0x1]  ;;  %v1391_v7 = vsel %vm1390_vm12, %v1386_v4, %v1388_v5 }
 0x155   : > { %vm1387_vm13 = vcmp.gt.f32.partialorder %v1385_v6, -1.0  ;;  %v1393_v10 = vmul.f32 10.0, %v1391_v7  ;;  %vm1406_vm14 = vcmp.gt.f32.partialorder %v1385_v6, 0.0  ;;  %v1442_v31 = vrot.slane %v1385_v6, %v1420_v23 }
 0x156   : > { %v1389_v8 = vsel %vm1387_vm13, %v1385_v6, %v1388_v5  ;;  %vm1408_vm0 = vmand %vm1406_vm14, %vm1407_vm15  ;;  %v1449_v33 = vrot.slane %v1391_v7, %v1420_v23 }
 0x157   : > { %v1392_v9 = vmul.f32 10.0, %v1389_v8  ;;  %v1613_v22 = vsel %vm1408_vm0, 1.0, %v1806_v21  ;;  %v1456_v35 = vrot.slane %v1389_v8, %v1420_v23 }
 0x158   : > { %v1421_v25 = vrot.slane %v1613_v22, %v1420_v23 }
 0x159   : > { %v1394_v11 = vmax.f32 %v1392_v9, %v1393_v10 }
 0x15a   : > { %v1423_v28 = vsel %vm1416_vm1, %v1421_v25, 0.0 }
 0x15b   : > { %v1395_v12 = vsub.f32 %v1392_v9, %v1394_v11  ;;  %v1398_v13 = vsub.f32 %v1393_v10, %v1394_v11 }
 0x15d   : > { %v1396_v14 = vmul.f32 1.442695, %v1395_v12  ;;  %v1399_v15 = vmul.f32 1.442695, %v1398_v13 }
 0x15f   : > { %1773 = vpow2.f32 %v1396_v14 }
 0x160   : > { %1775 = vpow2.f32 %v1399_v15 }
 0x169   : > { %v1774_v16 = vpop.eup %1773 }
 0x16a   : > { %v1776_v17 = vpop.eup %1775 }
 0x16b   : > { %v1401_v18 = vadd.f32 %v1776_v17, %v1774_v16 }
 0x16d   : > { %1777 = vlog2.f32 %v1401_v18 }
 0x177   : > { %v1778_v19 = vpop.eup %1777 }
 0x178   : > { %v1403_v20 = vmul.f32 0.6931472, %v1778_v19 }
 0x17a   : > { %v1404_v24 = vadd.f32 %v1403_v20, %v1394_v11 }
 0x17c   : > { %v1405_v26 = vsub.f32 %v1404_v24, %v1392_v9 }
 0x17e   : > { %v1428_v27 = vrot.slane %v1405_v26, %v1420_v23 }
 0x180   : > { %v1430_v30 = vsel %vm1415_vm2, %v1428_v27, %v1423_v28 }
 0x181   : > { %v1437_v32 = vsel %vm1414_vm3, %v1435_v29, %v1430_v30 }
 0x182   : > { %v1444_v34 = vsel %vm1413_vm4, %v1442_v31, %v1437_v32 }
 0x183   : > { %v1451_v36 = vsel %vm1412_vm5, %v1449_v33, %v1444_v34 }
 0x184   : > { %v1458_v37 = vsel %vm1411_vm6, %v1456_v35, %v1451_v36 }
 0x185   : > { %1459 = vst [vmem:[%s267_s23] sm:$0xff] %v1458_v37 }
 0x186 PF: > { %s14_s17 = sadd.s32 1, %s1801_s17   ;;  %s2000_s15 = smov %s1797_s16 }
 0x187   : > { %p11_p6 = scmp.ge.s32.totalorder %s14_s17, 4   ;;  %s2001_s16 = smov %s2003_s18 }
 0x189   :  { %13 = sbr.rel (!%p11_p6) target bundleno = 2 (0x2), region = 87 }

</bundles_post_ra>
